<compile_context>
chip_gen: v7x
topology: tpu7x:2x2x1
jax: 0.10.0
libtpu: 0.0.40
codegen_flags: <defaults>
</compile_context>

<pallas_src>
import math
import functools

import numpy as np
import jax
import jax.numpy as jnp
from jax.experimental import pallas as pl
from jax.experimental.pallas import tpu as pltpu

_HALF_PI = math.pi / 2.0


def _pe_coeffs(d_model, width, pack):
    """Per-lane (scale, bias) so pe(packed_row p, lane j) = sin(p*scale[j] + bias[j]).

    Lane j encodes feature k = j % d_model of position p*pack + j // d_model.
    """
    j = np.arange(width)
    k = j % d_model                                   # feature index
    off = (j // d_model).astype(np.float64)           # position offset within packed row
    two_i = (k - (k % 2)).astype(np.float64)          # 2 * (k // 2)
    inv_freq = np.exp(-(math.log(10000.0) / d_model) * two_i)
    phase = (k % 2).astype(np.float64) * _HALF_PI     # cos(x) = sin(x + pi/2)
    scale = pack * inv_freq
    bias = off * inv_freq + phase
    return np.stack([scale, bias], axis=0).astype(np.float32)   # (2, width)


def _host_pe_table(seq_len, d_model):
    """Trace-time (constant) PE table for tiny shapes; no kernel launch."""
    coeffs = _pe_coeffs(d_model, d_model, 1).astype(np.float64)
    pos = np.arange(seq_len, dtype=np.float64)[:, None]
    return np.sin(pos * coeffs[0][None, :] + coeffs[1][None, :]).astype(np.float32)


def _pe_kernel(coeff_ref, o_ref, *, tile_rows, width):
    # o_ref: (tile_rows, width) tile of the (lane-packed) PE table.
    row0 = pl.program_id(0) * tile_rows
    coeff = coeff_ref[...]                  # (2, width) in VMEM
    scale = coeff[0:1, :]                   # (1, width)
    bias = coeff[1:2, :]                    # (1, width)
    rows = (row0 + jax.lax.broadcasted_iota(jnp.int32, (tile_rows, width), 0)
            ).astype(jnp.float32)
    # Exactly one transcendental per element (cos folded into sin via bias).
    o_ref[...] = jnp.sin(rows * scale + bias).astype(o_ref.dtype)


def _round_up(x, m):
    return ((x + m - 1) // m) * m


def positional_embedding_table(seq_len, d_model, *, max_len=5000,
                               dtype=jnp.float32, max_tile_rows=2048,
                               min_kernel_bytes=128 * 1024):
    """Returns pe[:, :seq_len] of shape (1, seq_len, d_model)."""
    assert seq_len <= max_len, "seq_len exceeds max_len of the PE buffer"
    assert d_model % 2 == 0, "d_model must be even (sin/cos interleave)"

    itemsize = jnp.dtype(dtype).itemsize

    # Tiny tables: launching a kernel costs more than computing the table.
    if seq_len * d_model * itemsize < min_kernel_bytes:
        return jnp.asarray(_host_pe_table(seq_len, d_model), dtype=dtype)[None]

    # Lane packing: if d_model divides 128, pack r positions per 128-lane row
    # so output stores are lane-dense (unmasked vst) instead of masked.
    if d_model < 128 and 128 % d_model == 0:
        pack = 128 // d_model
    else:
        pack = 1
    width = pack * d_model
    packed_rows = pl.cdiv(seq_len, pack)

    # Row tile: as large as a conservative VMEM budget allows (4 MiB per output
    # buffer -> 8 MiB double-buffered; safe on v7x), multiple of 8 sublanes.
    bytes_per_row = width * itemsize
    budget_rows = max(8, ((4 * 1024 * 1024) // bytes_per_row) // 8 * 8)
    row_cap = min(max_tile_rows, budget_rows)

    if packed_rows <= row_cap:
        if packed_rows > 64:
            # Split into (at least) 2 grid steps so both v7x TCs get work.
            tile_rows = min(row_cap, _round_up(pl.cdiv(packed_rows, 2), 8))
        else:
            tile_rows = packed_rows          # single block == full array dims
    else:
        tile_rows = row_cap

    grid = (pl.cdiv(packed_rows, tile_rows),)
    coeffs = jnp.asarray(_pe_coeffs(d_model, width, pack))   # (2, width) f32

    packed = pl.pallas_call(
        functools.partial(_pe_kernel, tile_rows=tile_rows, width=width),
        out_shape=jax.ShapeDtypeStruct((packed_rows, width), dtype),
        grid_spec=pltpu.PrefetchScalarGridSpec(
            num_scalar_prefetch=0,
            grid=grid,
            in_specs=[pl.BlockSpec((2, width), lambda i: (0, 0))],
            out_specs=pl.BlockSpec((tile_rows, width), lambda i: (i, 0)),
        ),
        compiler_params=pltpu.CompilerParams(
            dimension_semantics=("parallel",),   # rows independent (megacore-friendly)
        ),
    )(coeffs)

    # Undo the lane packing and drop any padding positions in the last packed row.
    table = packed.reshape(packed_rows * pack, d_model)[:seq_len]
    return table[None]   # (1, seq_len, d_model), matching pe.unsqueeze(0)[:, :seq_len]


def positional_embedding_forward(x, d_model=None, max_len=5000, **kwargs):
    """Equivalent of PositionalEmbedding.forward: returns pe[:, :x.shape[1]].

    Output dtype defaults to float32 (the PyTorch buffer is .float()); pass
    dtype=jnp.bfloat16 to halve the writeback when the consumer is bf16.
    Only x.shape[1] is consumed, as in the reference module.
    """
    seq_len = x.shape[1]
    d = d_model if d_model is not None else x.shape[-1]
    return positional_embedding_table(seq_len, d, max_len=max_len, **kwargs)


if __name__ == "__main__":
    key = jax.random.PRNGKey(0)

    def torch_style_ref(seq_len, d_model):
        position = jnp.arange(0, seq_len, dtype=jnp.float32)[:, None]
        div_term = jnp.exp(jnp.arange(0, d_model, 2, dtype=jnp.float32)
                           * (-math.log(10000.0) / d_model))
        pe = jnp.zeros((seq_len, d_model), dtype=jnp.float32)
        pe = pe.at[:, 0::2].set(jnp.sin(position * div_term))
        pe = pe.at[:, 1::2].set(jnp.cos(position * div_term))
        return pe[None]

    # 1) Small shape consistent with the module (batch=2, seq=16, d_model=32).
    #    Force the Pallas kernel path (bypass disabled) to exercise it.
    B, S, D = 2, 16, 32
    x = jax.random.normal(key, (B, S, D), dtype=jnp.float32)
    out = jax.block_until_ready(
        positional_embedding_forward(x, d_model=D, min_kernel_bytes=0))
    ref = torch_style_ref(S, D)
    assert out.shape == (1, S, D)
    assert jnp.allclose(out, ref, atol=1e-5, rtol=1e-5)

    # 2) Default dispatch for the same tiny table (trace-time constant bypass).
    out_bypass = jax.block_until_ready(positional_embedding_forward(x, d_model=D))
    assert jnp.allclose(out_bypass, ref, atol=1e-5, rtol=1e-5)

    # 3) Lane-packed, multi-step path: d_model=64 -> 2 positions per 128-lane
    #    row, seq_len not a multiple of the packing factor, 2 grid steps.
    S2, D2 = 385, 64
    x2 = jnp.zeros((1, S2, D2), dtype=jnp.float32)
    out2 = jax.block_until_ready(
        positional_embedding_forward(x2, d_model=D2, min_kernel_bytes=0))
    assert out2.shape == (1, S2, D2)
    assert jnp.allclose(out2, torch_style_ref(S2, D2), atol=5e-4, rtol=1e-4)

    # 4) No-packing path (d_model not a divisor of 128), partial last block.
    S3, D3 = 200, 160
    x3 = jnp.zeros((1, S3, D3), dtype=jnp.float32)
    out3 = jax.block_until_ready(
        positional_embedding_forward(x3, d_model=D3, min_kernel_bytes=0))
    assert out3.shape == (1, S3, D3)
    assert jnp.allclose(out3, torch_style_ref(S3, D3), atol=5e-4, rtol=1e-4)

    print("KERNEL_OK")
</pallas_src>

<mosaic_0001>
module attributes {stable_mosaic.version = 11 : i64} {
  func.func @_pe_kernel(%arg0: i32, %arg1: memref<2x128xf32, #tpu.memory_space<vmem>>, %arg2: memref<4x128xf32, #tpu.memory_space<vmem>>) attributes {dimension_semantics = [#tpu.dimension_semantics<parallel>], iteration_bounds = array<i64: 1>, scalar_prefetch = 0 : i64, scratch_operands = 0 : i64, tpu.core_type = #tpu.core_type<tc>, window_params = [{pipeline_mode = #tpu.pipeline_mode<synchronous>, transform_indices = @transform_0, window_bounds = array<i64: 2, 128>}, {transform_indices = @transform_1, window_bounds = array<i64: 4, 128>}]} {
    %c4_i32 = arith.constant 4 : i32
    %0 = arith.muli %arg0, %c4_i32 : i32
    %c0 = arith.constant 0 : index
    %c0_0 = arith.constant 0 : index
    %1 = vector.load %arg1[%c0, %c0_0] : memref<2x128xf32, #tpu.memory_space<vmem>>, vector<2x128xf32>
    %2 = vector.extract_strided_slice %1 {offsets = [0, 0], sizes = [1, 128], strides = [1, 1]} : vector<2x128xf32> to vector<1x128xf32>
    %3 = vector.extract_strided_slice %1 {offsets = [1, 0], sizes = [1, 128], strides = [1, 1]} : vector<2x128xf32> to vector<1x128xf32>
    %4 = tpu.iota {dimensions = array<i32: 0>} : vector<4x128xi32>
    %5 = vector.broadcast %0 : i32 to vector<4x128xi32>
    %6 = arith.addi %5, %4 : vector<4x128xi32>
    %7 = arith.sitofp %6 : vector<4x128xi32> to vector<4x128xf32>
    %8 = vector.broadcast %2 : vector<1x128xf32> to vector<4x128xf32>
    %9 = arith.mulf %7, %8 : vector<4x128xf32>
    %10 = vector.broadcast %3 : vector<1x128xf32> to vector<4x128xf32>
    %11 = arith.addf %9, %10 : vector<4x128xf32>
    %12 = math.sin %11 : vector<4x128xf32>
    %c0_1 = arith.constant 0 : index
    %c0_2 = arith.constant 0 : index
    %13 = vector.load %arg2[%c0_1, %c0_2] : memref<4x128xf32, #tpu.memory_space<vmem>>, vector<4x128xf32>
    tpu.vector_store %arg2[%c0_1, %c0_2], %12 {strides = array<i32>} : memref<4x128xf32, #tpu.memory_space<vmem>>, vector<4x128xf32>,
    return
  }
  func.func @transform_0(%arg0: i32) -> (i32, i32) {
    %c0_i32 = arith.constant 0 : i32
    %c0_i32_0 = arith.constant 0 : i32
    %c0_i32_1 = arith.constant 0 : i32
    return %c0_i32, %c0_i32_0 : i32, i32
  }
  func.func @transform_1(%arg0: i32) -> (i32, i32) {
    %c0_i32 = arith.constant 0 : i32
    %c0_i32_0 = arith.constant 0 : i32
    return %arg0, %c0_i32 : i32, i32
  }
}

</mosaic_0001>

<bundles_post_ra>
// kernel: tpu_custom_call.1
= control target key start
LH: loop header
LB: loop body
LE: loop exit
PB: predicated region body
PF: predicated region fallthrough
CT: control target
= control target key end

     0   :  { %6 = vsyncpa [#allocation3], 0  ;;  %s289_s0 = inlined_call_operand.hbm [shape: f32[2,128], index: 0, kind: input, shape index: {}]   ;;  %s290_s1 = inlined_call_operand.hbm [shape: f32[4,128], index: 1, kind: output, shape index: {}]  }
   0x1   :  { %7 = vsyncpa [#allocation4], 0  ;;  %s226_s6 = smov [#allocation2]   ;;  %s178_s10 = scalar_lea.hbm %s289_s0, 32 }
   0x2   :  { %s14_s7 = sshll.u32 %s226_s6, 4  ;;  %p179_p0 = scmp.ne.s32.totalorder %s289_s0, %s178_s10  ;;  %s15_s7 = int_to_ptr.vmem [resolvable:$true] %s14_s7 }
   0x3   :  { %p182_p1 = scmp.lt.u32.totalorder %s178_s10, %s289_s0 }
   0x5   :  { %p184_p2 = pnand %p182_p1, %p179_p0 }
   0x7   :  { %187 = shalt.err (!%p184_p2)
}
   0x8   :  { %s188_s15 = scalar_lea.vmem %s15_s7, 32  ;;  %p193_p4 = scmp.lt.s32.totalorder %s15_s7, %s15_s7 }
   0x9   :  { %p189_p3 = scmp.ne.s32.totalorder %s15_s7, %s188_s15  ;;  %p194_p5 = scmp.lt.s32.totalorder %s188_s15, %s188_s15 }
   0xb   :  { %p195_p6 = por %p194_p5, %p193_p4 }
   0xd   :  { %p196_p7 = pnand %p195_p6, %p189_p3 }
   0xf   :  { %199 = shalt.err (!%p196_p7)
}
  0x10   :  { %17 = dma.hbm_to_vmem [thread:$0]  %s289_s0, 32, %s15_s7, [#allocation3]  }
  0x11   :  { %222 = dma.done.wait [#allocation3], 32  }
  0x12   :  { %223 = vsyncadd [#allocation3], 4294967264  ;;  %v23_v0 = vlaneseq  ;;  %v22_v5 = vld [vmem:[#allocation2] sm:$0x3]  ;;  %v227_v21 = vmov 683565275  }
  0x13   :  { %v228_v23 = vmov 2475754826   ;;  %v229_v25 = vmov 2131351028   ;;  %v230_v27 = vmov 2102212464  }
  0x14   :  { %v24_v1 = vshrl.u32 %v23_v0, 7  ;;  %v231_v29 = vmov 920167782   ;;  %v232_v36 = vmov 1326507024   ;;  %s233_s0 = smov [#allocation5]  }
  0x15   :  { %s149_s18 = sshll.u32 %s233_s0, 4  ;;  %s150_s18 = int_to_ptr.vmem [resolvable:$true] %s149_s18 }
  0x16   :  { %v30_v2 = vsub.s32 0, %v24_v1  ;;  %v35_v3 = vsub.s32 1, %v24_v1  ;;  %v27_v4 = vcvt.s32.f32 %v24_v1  ;;  %s200_s19 = scalar_lea.vmem %s150_s18, 64  ;;  %p205_p9 = scmp.lt.s32.totalorder %s150_s18, %s150_s18 }
  0x17   :  { %p201_p8 = scmp.ne.s32.totalorder %s150_s18, %s200_s19  ;;  %p206_p10 = scmp.lt.s32.totalorder %s200_s19, %s200_s19 }
  0x18   :  { %v31_v6 = vrot.slane %v22_v5, %v30_v2  ;;  %v36_v7 = vrot.slane %v22_v5, %v35_v3 }
  0x19   :  { %p207_p11 = por %p206_p10, %p205_p9 }
  0x1a   :  { %v32_v8 = vmul.f32 %v31_v6, %v27_v4 }
  0x1b   :  { %p208_p12 = pnand %p207_p11, %p201_p8 }
  0x1c   :  { %v256_v9 = vadd.f32 %v36_v7, %v32_v8 }
  0x1e   :  { %v41_v10 = vand.u32 2139095040, %v256_v9  ;;  %v38_v12 = vand.u32 2147483647, %v256_v9  ;;  %vm40_vm7 = vcmp.lt.s32.totalorder %v256_v9, 0  ;;  %vm130_vm12 = vweird.f32 %v256_v9 }
  0x20   :  { %v42_v11 = vshrl.u32 %v41_v10, 23  ;;  %v45_v15 = vand.u32 8388607, %v38_v12  ;;  %vm39_vm8 = vcmp.le.f32.partialorder %v38_v12, 0.7853982 }
  0x22   :  { %v158_v13 = vadd.s32 4294967169, %v42_v11  ;;  %v46_v18 = vor.u32 8388608, %v45_v15 }
  0x24   :  { %v48_v14 = vadd.s32 1, %v158_v13  ;;  %v86_v38 = vshll.u32 %v46_v18, 8 }
  0x26   :  { %vm49_vm0 = vcmp.gt.s32.totalorder %v48_v14, 0 }
  0x27   :  { %v50_v16 = vsel %vm49_vm0, %v48_v14, 0 }
  0x28   :  { %v52_v17 = vand.u32 31, %v50_v16  ;;  %v51_v19 = vshrl.u32 %v50_v16, 5 }
  0x2a   :  { %v53_v20 = vsub.s32 32, %v52_v17  ;;  %v55_v22 = vshll.u32 %v227_v21, %v52_v17  ;;  %v58_v24 = vshll.u32 %v228_v23, %v52_v17  ;;  %v61_v26 = vshll.u32 %v229_v25, %v52_v17 }
  0x2b   :  { %v64_v28 = vshll.u32 %v230_v27, %v52_v17  ;;  %v67_v30 = vshll.u32 %v231_v29, %v52_v17  ;;  %vm70_vm1 = vcmp.lt.s32.totalorder %v51_v19, 1  ;;  %vm73_vm2 = vcmp.lt.s32.totalorder %v51_v19, 4 }
  0x2c   :  { %v54_v31 = vshrl.u32 %v227_v21, %v53_v20  ;;  %v56_v32 = vshrl.u32 %v228_v23, %v53_v20  ;;  %v59_v33 = vshrl.u32 %v229_v25, %v53_v20  ;;  %v62_v34 = vshrl.u32 %v230_v27, %v53_v20 }
  0x2d   :  { %v65_v35 = vshrl.u32 %v231_v29, %v53_v20  ;;  %v68_v37 = vshrl.u32 %v232_v36, %v53_v20  ;;  %vm71_vm3 = vcmp.lt.s32.totalorder %v51_v19, 2  ;;  %vm72_vm4 = vcmp.lt.s32.totalorder %v51_v19, 3 }
  0x2e   :  { %v57_v39 = vor.u32 %v56_v32, %v55_v22  ;;  %v60_v40 = vor.u32 %v59_v33, %v58_v24  ;;  %v63_v41 = vor.u32 %v62_v34, %v61_v26 }
  0x2f   :  { %v66_v42 = vor.u32 %v65_v35, %v64_v28  ;;  %v69_v43 = vor.u32 %v68_v37, %v67_v30 }
  0x30   :  { %v74_v44 = vsel %vm70_vm1, %v54_v31, %v57_v39  ;;  %v75_v45 = vsel %vm73_vm2, %v63_v41, 2102212464  ;;  %v78_v46 = vsel %vm70_vm1, %v57_v39, %v60_v40  ;;  %v82_v47 = vsel %vm70_vm1, %v60_v40, %v63_v41 }
  0x31   :  { %v76_v48 = vsel %vm72_vm4, %v60_v40, %v75_v45  ;;  %v79_v49 = vsel %vm73_vm2, %v66_v42, 920167782  ;;  %v83_v50 = vsel %vm73_vm2, %v69_v43, 1326507024 }
  0x32   :  { %v80_v51 = vsel %vm72_vm4, %v63_v41, %v79_v49  ;;  %v84_v52 = vsel %vm72_vm4, %v66_v42, %v83_v50  ;;  %v77_v53 = vsel %vm71_vm3, %v74_v44, %v76_v48 }
  0x33   :  { %v81_v54 = vsel %vm71_vm3, %v78_v46, %v80_v51  ;;  %v85_v55 = vsel %vm71_vm3, %v82_v47, %v84_v52  ;;  %v93_v60 = vmul.u32 %v86_v38, %v77_v53 }
  0x34   :  { %v262_v56 = vmul.u32.u64.low %v86_v38, %v85_v55  ;;  %v263_v57 = vmul.u32.u64.high %v86_v38, %v85_v55, %v262_v56  ;;  %v265_v58 = vmul.u32.u64.low %v86_v38, %v81_v54  ;;  %v266_v59 = vmul.u32.u64.high %v86_v38, %v81_v54, %v265_v58 }
  0x36   :  { %vm95_vm5 = vc.u32 %v263_v57, %v265_v58  ;;  %v96_v61 = vadd.s32 1, %v266_v59  ;;  %v94_v8 = vadd.s32 %v265_v58, %v263_v57 }
  0x38   :  { %v97_v62 = vsel %vm95_vm5, %v96_v61, %v266_v59 }
  0x39   :  { %v98_v63 = vadd.s32 %v97_v62, %v93_v60 }
  0x3b   :  { %v99_v0 = vadd.s32 536870912, %v98_v63 }
  0x3d   :  { %v100_v1 = vshrl.u32 %v99_v0, 30 }
  0x3f   :  { %v101_v2 = vshll.u32 %v100_v1, 30  ;;  %v124_v22 = vsub.s32 4, %v100_v1 }
  0x41   :  { %v102_v3 = vsub.s32 %v98_v63, %v101_v2  ;;  %v125_v25 = vsel %vm40_vm7, %v124_v22, %v100_v1 }
  0x42   :  { %v127_v28 = vsel %vm39_vm8, 0, %v125_v25 }
  0x43   :  { %v104_v4 = vsub.s32 0, %v102_v3  ;;  %v131_v29 = vadd.s32 3, %v127_v28 }
  0x45   :  { %v159_v5 = vmin.u32 %v104_v4, %v102_v3  ;;  %v132_v30 = vand.u32 3, %v131_v29 }
  0x47   :  { %v106_v6 = vclz %v159_v5  ;;  %vm137_vm9 = vcmp.eq.s32.totalorder %v132_v30, 2  ;;  %vm134_vm10 = vcmp.eq.s32.totalorder %v132_v30, 0  ;;  %vm133_vm11 = vcmp.lt.s32.totalorder %v132_v30, 2 }
  0x49   :  { %v160_v7 = vadd.s32 4294967294, %v106_v6 }
  0x4b   :  { %vm161_vm6 = vcmp.lt.s32.totalorder %v160_v7, 0 }
  0x4c   :  { %v109_v10 = vsel %vm161_vm6, 0, %v160_v7 }
  0x4d   :  { %v110_v11 = vsub.s32 32, %v109_v10  ;;  %v111_v13 = vshll.u32 %v102_v3, %v109_v10  ;;  %v114_v14 = vsub.s32 4294967266, %v109_v10 }
  0x4f   :  { %v112_v15 = vshrl.u32 %v94_v8, %v110_v11  ;;  %v115_v16 = vadd.s32 127, %v114_v14 }
  0x51   :  { %v113_v17 = vor.u32 %v112_v15, %v111_v13  ;;  %v116_v18 = vshll.u32 %v115_v16, 23 }
  0x53   :  { %v117_v19 = vor.u32 4788187, %v116_v18  ;;  %v120_v20 = vcvt.s32.f32 %v113_v17 }
  0x55   :  { %v118_v21 = vand.u32 2147483647, %v117_v19 }
  0x57   :  { %v121_v23 = vmul.f32 %v120_v20, %v118_v21 }
  0x59   :  { %v122_v24 = vxor.u32 2147483648, %v121_v23 }
  0x5b   :  { %v123_v26 = vsel %vm40_vm7, %v122_v24, %v121_v23 }
  0x5c   :  { %v126_v27 = vsel %vm39_vm8, %v256_v9, %v123_v26 }
  0x5d   :  { %174 = vcosq.f32 %v126_v27 }
  0x5e   :  { %176 = vsinq.f32 %v126_v27 }
  0x67   :  { %v175_v31 = vpop.eup %174 }
  0x68   :  { %v177_v32 = vpop.eup %176  ;;  %v138_v33 = vxor.u32 2147483648, %v175_v31 }
  0x69   :  { %v135_v34 = vxor.u32 2147483648, %v177_v32 }
  0x6a   :  { %v139_v12 = vsel %vm137_vm9, %v138_v33, %v177_v32 }
  0x6b   :  { %v136_v35 = vsel %vm134_vm10, %v175_v31, %v135_v34 }
  0x6c   :  { %v140_v36 = vsel %vm133_vm11, %v136_v35, %v139_v12 }
  0x6d   :  { %v141_v37 = vsel %vm130_vm12, nan, %v140_v36 }
  0x6e   :  { %142 = vst [vmem:[#allocation5] sm:$0xf] %v141_v37 }
  0x6f   :  { %211 = shalt.err (!%p208_p12)
}
  0x70   :  { %s212_s22 = scalar_lea.hbm %s290_s1, 64 }
  0x71   :  { %p213_p13 = scmp.ne.s32.totalorder %s290_s1, %s212_s22  ;;  %p216_p0 = scmp.lt.u32.totalorder %s212_s22, %s290_s1 }
  0x73   :  { %p218_p1 = pnand %p216_p0, %p213_p13 }
  0x75   :  { %221 = shalt.err (!%p218_p1)
}
  0x76   :  { %152 = dma.vmem_to_hbm [thread:$0]  %s150_s18, 64, %s290_s1, [#allocation4]  }
  0x77   :  { %224 = dma.done.wait [#allocation4], 64  }
  0x78   :  { %225 = vsyncadd [#allocation4], 4294967232 }
  0x79   :  { %156 = vsyncpa [#allocation3], 1 }
  0x7a   :  { %157 = vsyncpa [#allocation4], 1 }

</bundles_post_ra>
